<compile_context>
chip_gen: v7x
topology: tpu7x:2x2x1
jax: 0.10.0
libtpu: 0.0.40
codegen_flags: <defaults>
</compile_context>

<pallas_src>
import jax
import jax.numpy as jnp
from jax.experimental import pallas as pl
from jax.experimental.pallas import tpu as pltpu

_SUBLANE = 8


def _round_up(n, m):
    return ((n + m - 1) // m) * m


# ----------------------------------------------------------------------------
# Kernels: hooked feature extraction (Linear + ReLU, with the ones-column folded
# in as an extra hidden unit) fused with the dual linear head.
# ----------------------------------------------------------------------------
def _fwd_kernel(x_ref, w1_ref, b1_ref, wd_ref, out_ref):
    # h == concat([ReLU(x @ W1 + b1), 1])  because W1's last column is 0 and
    # b1's last entry is 1 (folded in prepare_params).        shape (TB, H+1)
    h = jnp.dot(x_ref[...], w1_ref[...], preferred_element_type=jnp.float32)
    h = jnp.maximum(h + b1_ref[...].astype(jnp.float32), 0.0)
    out_ref[...] = jnp.dot(h.astype(wd_ref.dtype), wd_ref[...],
                           preferred_element_type=jnp.float32)


def _fwd_kernel_feats(x_ref, w1_ref, b1_ref, wd_ref, out_ref, feat_ref):
    h = jnp.dot(x_ref[...], w1_ref[...], preferred_element_type=jnp.float32)
    h = jnp.maximum(h + b1_ref[...].astype(jnp.float32), 0.0)
    feat_ref[...] = h          # already the ones-augmented features (B, H+1)
    out_ref[...] = jnp.dot(h.astype(wd_ref.dtype), wd_ref[...],
                           preferred_element_type=jnp.float32)


# ----------------------------------------------------------------------------
# One-time parameter preparation (NOT per forward call).
# ----------------------------------------------------------------------------
def prepare_params(params, dtype=jnp.float32):
    """Fold the ones-column into the hooked layer and (optionally) cast to bf16."""
    w1, b1, wd = params["w1"], params["b1"], params["wd"]
    d_in, hidden = w1.shape
    # Extra hidden unit: zero weights + bias 1  ->  ReLU(0 + 1) == 1.
    w1x = jnp.concatenate([w1, jnp.zeros((d_in, 1), w1.dtype)], axis=1)   # (D, H+1)
    b1x = jnp.concatenate([b1, jnp.ones((1, 1), b1.dtype)], axis=1)       # (1, H+1)
    return {"w1x": w1x.astype(dtype),
            "b1x": b1x.astype(dtype),
            "wd": wd.astype(dtype)}                                       # (H+1, OUT)


# ----------------------------------------------------------------------------
# Wrapper ("LinearDualNetwork.forward")
# ----------------------------------------------------------------------------
def linear_dual_forward(x, prep, with_features=False, tb_max=512):
    """x: (B, D_in). Returns (B, output_dim) [, (B, H+1) augmented features]."""
    w1x, b1x, wd = prep["w1x"], prep["b1x"], prep["wd"]
    B, D = x.shape
    Dw, Hx = w1x.shape            # Hx = hidden + 1
    OUT = wd.shape[1]
    assert D == Dw and wd.shape[0] == Hx

    dtype = w1x.dtype
    xin = x.astype(dtype)

    # Batch tile: as large as tb_max (amortizes ~0.35us/grid-step), sublane
    # aligned; small batches get a single exact-size tile (no padding, no slice).
    TB = min(_round_up(B, _SUBLANE), _round_up(tb_max, _SUBLANE))
    Bp = _round_up(B, TB)
    if Bp != B:
        xin = jnp.pad(xin, ((0, Bp - B), (0, 0)))   # padded rows are sliced off below
    grid = (Bp // TB,)

    in_specs = [
        pl.BlockSpec((TB, D), lambda i: (i, 0)),     # x: streamed over batch tiles
        pl.BlockSpec((D, Hx), lambda i: (0, 0)),     # W1 (+0 col): resident
        pl.BlockSpec((1, Hx), lambda i: (0, 0)),     # b1 (+1):     resident
        pl.BlockSpec((Hx, OUT), lambda i: (0, 0)),   # dual weight: resident
    ]
    out_spec = pl.BlockSpec((TB, OUT), lambda i: (i, 0))

    isz = jnp.dtype(dtype).itemsize
    io_tile = TB * D * isz + TB * OUT * 4 + (TB * Hx * 4 if with_features else 0)
    w_bytes = (D * Hx + Hx + Hx * OUT) * isz
    vmem_limit = int(min(max(4 * (2 * io_tile + 2 * w_bytes) + (1 << 20), 8 << 20),
                         48 << 20))                  # explicit; safe on 64 MiB v7x
    cparams = pltpu.CompilerParams(
        dimension_semantics=("parallel",),           # 2-TC sharding on v7x
        vmem_limit_bytes=vmem_limit)

    flops = 2 * Bp * Hx * (D + OUT)
    bytes_accessed = (Bp * D * isz + w_bytes + Bp * OUT * 4
                      + (Bp * Hx * 4 if with_features else 0))
    cost = pl.CostEstimate(flops=flops, transcendentals=0,
                           bytes_accessed=bytes_accessed)

    if with_features:
        out_p, feat_p = pl.pallas_call(
            _fwd_kernel_feats,
            out_shape=(jax.ShapeDtypeStruct((Bp, OUT), jnp.float32),
                       jax.ShapeDtypeStruct((Bp, Hx), jnp.float32)),
            grid=grid,
            in_specs=in_specs,
            out_specs=(out_spec, pl.BlockSpec((TB, Hx), lambda i: (i, 0))),
            compiler_params=cparams,
            cost_estimate=cost,
        )(xin, w1x, b1x, wd)
        return out_p[:B], feat_p[:B]     # no-op slices when Bp == B

    out_p = pl.pallas_call(
        _fwd_kernel,
        out_shape=jax.ShapeDtypeStruct((Bp, OUT), jnp.float32),
        grid=grid,
        in_specs=in_specs,
        out_specs=out_spec,
        compiler_params=cparams,
        cost_estimate=cost,
    )(xin, w1x, b1x, wd)
    return out_p[:B]


# ----------------------------------------------------------------------------
# Deterministic synthetic parameters (no checkpoint loading).
# ----------------------------------------------------------------------------
def make_params(key, d_in, hidden, n_classes, output_dim):
    k1, k2, k3, k4 = jax.random.split(key, 4)
    w1 = jax.random.normal(k1, (d_in, hidden), jnp.float32) * 0.1
    b1 = jax.random.normal(k2, (1, hidden), jnp.float32) * 0.1
    w2 = jax.random.normal(k3, (hidden, n_classes), jnp.float32) * 0.1  # final inner
    # layer; its output is discarded by LinearDualNetwork.forward (not computed).
    wd = jax.random.normal(k4, (hidden + 1, output_dim), jnp.float32) * 0.1
    return {"w1": w1, "b1": b1, "w2": w2, "wd": wd}


def _reference(x, params):
    h = jnp.maximum(x @ params["w1"] + params["b1"], 0.0)
    feats_aug = jnp.concatenate([h, jnp.ones((x.shape[0], 1), x.dtype)], axis=1)
    return feats_aug @ params["wd"], feats_aug


if __name__ == "__main__":
    B, D_IN, HIDDEN, N_CLASSES, OUTPUT_DIM = 8, 16, 32, 10, 4

    key = jax.random.PRNGKey(0)
    kx, kp = jax.random.split(key)
    x = jax.random.normal(kx, (B, D_IN), jnp.float32)
    params = make_params(kp, D_IN, HIDDEN, N_CLASSES, OUTPUT_DIM)
    prep = prepare_params(params)                       # one-time weight prep

    ref_out, ref_feats = _reference(x, params)

    out = jax.block_until_ready(linear_dual_forward(x, prep, with_features=False))
    out_f, feats = linear_dual_forward(x, prep, with_features=True)
    out_f = jax.block_until_ready(out_f)
    feats = jax.block_until_ready(feats)

    assert out.shape == (B, OUTPUT_DIM)
    assert feats.shape == (B, HIDDEN + 1)
    assert jnp.allclose(out, ref_out, atol=1e-5, rtol=1e-5), "out mismatch"
    assert jnp.allclose(out_f, ref_out, atol=1e-5, rtol=1e-5), "out (feat path) mismatch"
    assert jnp.allclose(feats, ref_feats, atol=1e-5, rtol=1e-5), "features mismatch"

    # Multi-tile grid + non-divisible batch (exercises batch padding/slicing).
    B2 = 24
    x2 = jax.random.normal(jax.random.PRNGKey(1), (B2, D_IN), jnp.float32)
    out2 = jax.block_until_ready(linear_dual_forward(x2, prep, tb_max=16))
    ref2, _ = _reference(x2, params)
    assert jnp.allclose(out2, ref2, atol=1e-5, rtol=1e-5), "multi-tile mismatch"

    # Opt-in bf16 weights/activations (halves HBM traffic & resident VMEM on
    # v6e/v7x); f32 accumulation in the MXU, looser tolerance.
    prep_bf16 = prepare_params(params, dtype=jnp.bfloat16)
    out_bf = jax.block_until_ready(linear_dual_forward(x, prep_bf16))
    assert jnp.allclose(out_bf, ref_out, atol=5e-2, rtol=5e-2), "bf16 path mismatch"

    print("KERNEL_OK")
</pallas_src>

<mosaic_0001>
module attributes {stable_mosaic.version = 11 : i64} {
  func.func @_fwd_kernel(%arg0: i32, %arg1: memref<8x16xf32, #tpu.memory_space<vmem>>, %arg2: memref<16x33xf32, #tpu.memory_space<vmem>>, %arg3: memref<1x33xf32, #tpu.memory_space<vmem>>, %arg4: memref<33x4xf32, #tpu.memory_space<vmem>>, %arg5: memref<8x4xf32, #tpu.memory_space<vmem>>) attributes {dimension_semantics = [#tpu.dimension_semantics<parallel>], iteration_bounds = array<i64: 1>, scalar_prefetch = 0 : i64, scratch_operands = 0 : i64, tpu.core_type = #tpu.core_type<tc>, window_params = [{transform_indices = @transform_0, window_bounds = array<i64: 8, 16>}, {pipeline_mode = #tpu.pipeline_mode<synchronous>, transform_indices = @transform_1, window_bounds = array<i64: 16, 33>}, {pipeline_mode = #tpu.pipeline_mode<synchronous>, transform_indices = @transform_2, window_bounds = array<i64: 1, 33>}, {pipeline_mode = #tpu.pipeline_mode<synchronous>, transform_indices = @transform_3, window_bounds = array<i64: 33, 4>}, {transform_indices = @transform_4, window_bounds = array<i64: 8, 4>}]} {
    %c0 = arith.constant 0 : index
    %c0_0 = arith.constant 0 : index
    %0 = vector.load %arg1[%c0, %c0_0] : memref<8x16xf32, #tpu.memory_space<vmem>>, vector<8x16xf32>
    %c0_1 = arith.constant 0 : index
    %c0_2 = arith.constant 0 : index
    %1 = vector.load %arg2[%c0_1, %c0_2] : memref<16x33xf32, #tpu.memory_space<vmem>>, vector<16x33xf32>
    %cst = arith.constant dense<0.000000e+00> : vector<8x33xf32>
    %2 = tpu.matmul %0, %1, %cst {dimension_numbers = #tpu.dot_dimension_numbers<[1], [0], [0], [1], [0, 0, 1, 1], [], []>} : vector<8x16xf32>, vector<16x33xf32>, vector<8x33xf32> -> vector<8x33xf32>
    %c0_3 = arith.constant 0 : index
    %c0_4 = arith.constant 0 : index
    %3 = vector.load %arg3[%c0_3, %c0_4] : memref<1x33xf32, #tpu.memory_space<vmem>>, vector<1x33xf32>
    %4 = vector.broadcast %3 : vector<1x33xf32> to vector<8x33xf32>
    %5 = arith.addf %2, %4 : vector<8x33xf32>
    %cst_5 = arith.constant 0.000000e+00 : f32
    %6 = vector.broadcast %cst_5 : f32 to vector<8x33xf32>
    %7 = arith.maximumf %5, %6 : vector<8x33xf32>
    %c0_6 = arith.constant 0 : index
    %c0_7 = arith.constant 0 : index
    %8 = vector.load %arg4[%c0_6, %c0_7] : memref<33x4xf32, #tpu.memory_space<vmem>>, vector<33x4xf32>
    %cst_8 = arith.constant dense<0.000000e+00> : vector<8x4xf32>
    %9 = tpu.matmul %7, %8, %cst_8 {dimension_numbers = #tpu.dot_dimension_numbers<[1], [0], [0], [1], [0, 0, 1, 1], [], []>} : vector<8x33xf32>, vector<33x4xf32>, vector<8x4xf32> -> vector<8x4xf32>
    %c0_9 = arith.constant 0 : index
    %c0_10 = arith.constant 0 : index
    %10 = vector.load %arg5[%c0_9, %c0_10] : memref<8x4xf32, #tpu.memory_space<vmem>>, vector<8x4xf32>
    tpu.vector_store %arg5[%c0_9, %c0_10], %9 {strides = array<i32>} : memref<8x4xf32, #tpu.memory_space<vmem>>, vector<8x4xf32>,
    return
  }
  func.func @transform_0(%arg0: i32) -> (i32, i32) {
    %c0_i32 = arith.constant 0 : i32
    %c0_i32_0 = arith.constant 0 : i32
    return %arg0, %c0_i32 : i32, i32
  }
  func.func @transform_1(%arg0: i32) -> (i32, i32) {
    %c0_i32 = arith.constant 0 : i32
    %c0_i32_0 = arith.constant 0 : i32
    %c0_i32_1 = arith.constant 0 : i32
    return %c0_i32, %c0_i32_0 : i32, i32
  }
  func.func @transform_2(%arg0: i32) -> (i32, i32) {
    %c0_i32 = arith.constant 0 : i32
    %c0_i32_0 = arith.constant 0 : i32
    %c0_i32_1 = arith.constant 0 : i32
    return %c0_i32, %c0_i32_0 : i32, i32
  }
  func.func @transform_3(%arg0: i32) -> (i32, i32) {
    %c0_i32 = arith.constant 0 : i32
    %c0_i32_0 = arith.constant 0 : i32
    %c0_i32_1 = arith.constant 0 : i32
    return %c0_i32, %c0_i32_0 : i32, i32
  }
  func.func @transform_4(%arg0: i32) -> (i32, i32) {
    %c0_i32 = arith.constant 0 : i32
    %c0_i32_0 = arith.constant 0 : i32
    return %arg0, %c0_i32 : i32, i32
  }
}

</mosaic_0001>

<bundles_post_ra>
// kernel: tpu_custom_call.1
= control target key start
LH: loop header
LB: loop body
LE: loop exit
PB: predicated region body
PF: predicated region fallthrough
CT: control target
= control target key end

     0   :  { %v236_v0 = vmov 0.0|0.0   ;;  %vm237_vm0 = vmmov 0   ;;  %v238_v3 = vmov 0.0   ;;  %vm27_vm1 = vcmask 130048   ;;  %s294_s1 = inlined_call_operand.vmem [shape: f32[16,33], index: 1, kind: input, shape index: {}]   ;;  %s295_s3 = inlined_call_operand.vmem [shape: f32[33,4], index: 3, kind: input, shape index: {}]   ;;  %s296_s0 = inlined_call_operand.vmem [shape: f32[8,16], index: 0, kind: input, shape index: {}]   ;;  %s297_s2 = inlined_call_operand.vmem [shape: f32[1,33], index: 2, kind: input, shape index: {}]   ;;  %s298_s4 = inlined_call_operand.vmem [shape: f32[8,4], index: 4, kind: output, shape index: {}]  }
   0x1   :  { %224 = vmatprep.subr.bf16.mxu0 %v236_v0  ;;  %v18_v1 = vld [vmem:[%s294_s1] sm:$0xff]  ;;  %v19_v2 = vld [vmem:[%s294_s1 + $0x8] sm:$0xff]  ;;  %208 = vmatprep.mubr.msk.f32.mxu0 %vm237_vm0, %v238_v3  ;;  %v104_v9 = vld [vmem:[%s295_s3 + $0x10] sm:$0xff]  ;;  %vm111_vm2 = vcmask 1040384   ;;  %vm107_vm3 = vcmask 269312   ;;  %vm185_vm4 = vcmask 31744  }
   0x2   :  { %v225_v4 = vpack.c.bf16 %v19_v2, %v18_v1  ;;  %227 = vmatprep.subr.bf16.mxu1 %v236_v0  ;;  %v102_v5 = vld [vmem:[%s295_s3] sm:$0xff]  ;;  %v103_v6 = vld [vmem:[%s295_s3 + $0x8] sm:$0xff]  ;;  %221 = vmatprep.mubr.msk.f32.mxu1 %vm237_vm0, %v238_v3  ;;  %v105_v10 = vld [vmem:[%s295_s3 + $0x18] sm:$0xff] }
   0x3   :  { %v228_v7 = vpack.c.bf16 %v103_v6, %v102_v5  ;;  %v17_v8 = vld [vmem:[%s296_s0] sm:$0xff]  ;;  %v231_v11 = vpack.c.bf16 %v105_v10, %v104_v9 }
   0x4   :  { %226 = vmatpush3.bf16.msra.mxu0 %v225_v4  ;;  %v106_v12 = vld [vmem:[%s295_s3 + $0x20] sm:$0x1] }
   0x5   :  { %229 = vmatpush3.bf16.msra.mxu1 %v228_v7  ;;  %v191_v13 = vld [vmem:[%s297_s2] ss:$0 sm:$0xff] }
   0x6   :  { %230 = vmatprep.subr.bf16.mxu1 %v236_v0 }
   0x7   :  { %209 = vmatmul.mubr.msk.f32.vlgmr.msra.gmra.mrb[0].mxu0 %vm27_vm1, %v17_v8 }
   0x9   :  { %232 = vmatpush3.bf16.msra.mxu1 %v231_v11 }
   0xa   :  { %219 = vmatprep.subr.mxu1 %v238_v3 }
   0xd   :  { %220 = vmatpush3.msk.msra.mxu1 %vm111_vm2, %v106_v12 }
  0xda   :  { %v97_v14 = vpop.f32.mrb[0].mxu0 }
  0xdb   :  { %v98_v15 = vadd.f32 %v191_v13, %v97_v14  ;;  %v210_v16 = vpop.f32.mrb[1].mxu0 }
  0xdd   :  { %v101_v17 = vmax.f32 %v98_v15, 0.0 }
  0xdf   :  { %222 = vmatmul.mubr.msk.f32.vlgmr.msra.gmra.mrb[0].mxu1 %vm107_vm3, %v101_v17 }
 0x1b2   :  { %v181_v18 = vpop.f32.mrb[0].mxu1 }
 0x1b3   :  { %186 = vst.msk [vmem:[%s298_s4] sm:$0xff] %vm185_vm4, %v181_v18  ;;  %v223_v19 = vpop.f32.mrb[1].mxu1 }

</bundles_post_ra>
